<compile_context>
chip_gen: v7x
topology: tpu7x:2x2x1
jax: 0.10.0
libtpu: 0.0.40
codegen_flags: <defaults>
</compile_context>

<pallas_src>
import jax
import jax.numpy as jnp
from jax.experimental import pallas as pl
from jax.experimental.pallas import tpu as pltpu


def _round_up(x, m):
    return ((x + m - 1) // m) * m


def _linear_block_kernel(x_ref, w_ref, b_ref, o_ref, acc_ref):
    """Computes one (tm, tn) output tile; K is the innermost ('arbitrary') axis."""
    k = pl.program_id(2)

    @pl.when(k == 0)
    def _init():
        acc_ref[...] = jnp.zeros_like(acc_ref)

    # Pre-active block: ReLU on the VPU fused ahead of the MXU matmul.
    x = jnp.maximum(x_ref[...], 0)
    acc_ref[...] += jnp.dot(x, w_ref[...], preferred_element_type=jnp.float32)

    @pl.when(k == pl.num_programs(2) - 1)
    def _finalize():
        # Bias is added once per output tile, only on the final K step.
        o_ref[...] = (acc_ref[...] + b_ref[...]).astype(o_ref.dtype)


def linear_block(x, w_t, b, *, tm=256, tn=256, tk=512, operand_dtype=None):
    """relu(x) @ w_t + b.

    x:   (N, C_in)
    w_t: (C_in, C_out)   PyTorch nn.Linear weight, pre-transposed
    b:   (C_out,) or (1, C_out)
    operand_dtype: e.g. jnp.bfloat16 to hit v6e/v7x MXU peak (accum stays f32).
    """
    N, C_in = x.shape
    C_out = w_t.shape[1]
    out_dtype = x.dtype
    op_dtype = jnp.dtype(operand_dtype) if operand_dtype is not None else jnp.dtype(x.dtype)

    # Clamp tiles to the aligned problem size: sublane dim multiple of 8,
    # lane dims multiples of 128 so every load/store is lane-dense (unmasked).
    tm = min(tm, _round_up(N, 8))
    tn = min(tn, _round_up(C_out, 128))
    tk = min(tk, _round_up(C_in, 128))

    Np = _round_up(N, tm)
    Kp = _round_up(C_in, tk)
    Cp = _round_up(C_out, tn)

    # Zero padding is exact: relu(0)=0, zero K rows/cols contribute nothing to the
    # accumulator, padded bias columns are zero; padding is sliced off afterwards.
    xp = x.astype(op_dtype)
    if (Np, Kp) != (N, C_in):
        xp = jnp.zeros((Np, Kp), op_dtype).at[:N, :C_in].set(xp)
    wp = w_t.astype(op_dtype)
    if (Kp, Cp) != (C_in, C_out):
        wp = jnp.zeros((Kp, Cp), op_dtype).at[:C_in, :C_out].set(wp)
    bp = jnp.reshape(b, (1, C_out)).astype(jnp.float32)
    if Cp != C_out:
        bp = jnp.zeros((1, Cp), jnp.float32).at[:, :C_out].set(bp)

    grid = (Np // tm, Cp // tn, Kp // tk)

    op_bytes = op_dtype.itemsize
    out_bytes = jnp.dtype(out_dtype).itemsize
    # Double-buffered input/output tiles + f32 accumulator scratch, with headroom;
    # capped at 64 MiB so a v6e-sized request never exceeds v7x's physical VMEM.
    tile_bytes = (2 * (tm * tk + tk * tn) * op_bytes       # x, w double buffers
                  + 2 * tn * 4                             # bias double buffer
                  + 2 * tm * tn * out_bytes                # output double buffer
                  + tm * tn * 4)                           # accumulator scratch
    vmem_limit = int(min(max(4 * tile_bytes, 16 * 1024 * 1024), 64 * 1024 * 1024))

    cost = pl.CostEstimate(
        flops=2 * Np * Kp * Cp,
        transcendentals=0,
        bytes_accessed=(xp.size * op_bytes + wp.size * op_bytes
                        + bp.size * 4 + Np * Cp * out_bytes),
    )

    out = pl.pallas_call(
        _linear_block_kernel,
        out_shape=jax.ShapeDtypeStruct((Np, Cp), out_dtype),
        grid_spec=pltpu.PrefetchScalarGridSpec(
            num_scalar_prefetch=0,
            grid=grid,
            in_specs=[
                pl.BlockSpec((tm, tk), lambda i, j, k: (i, k)),   # x tile
                pl.BlockSpec((tk, tn), lambda i, j, k: (k, j)),   # w tile
                pl.BlockSpec((1, tn), lambda i, j, k: (0, j)),    # bias tile (N-tile only)
            ],
            out_specs=pl.BlockSpec((tm, tn), lambda i, j, k: (i, j)),
            scratch_shapes=[pltpu.VMEM((tm, tn), jnp.float32)],
        ),
        compiler_params=pltpu.CompilerParams(
            dimension_semantics=("parallel", "parallel", "arbitrary"),
            vmem_limit_bytes=vmem_limit,
        ),
        cost_estimate=cost,
    )(xp, wp, bp)

    if (Np, Cp) != (N, C_out):
        out = out[:N, :C_out]
    return out


if __name__ == "__main__":
    # Small shapes consistent with LinearBlock(C_in=32, C_out=64) applied to N=8 rows.
    # NOTE: at this toy size the call is dominated by fixed launch/DMA overhead and
    # plain XLA would win; the tiled design above is for realistic N/C_in/C_out.
    N, C_in, C_out = 8, 32, 64

    key = jax.random.PRNGKey(0)
    kx, kw, kb = jax.random.split(key, 3)

    # Deterministic synthetic parameters (mimic nn.Linear uniform init bounds).
    bound = 1.0 / jnp.sqrt(C_in)
    x = jax.random.normal(kx, (N, C_in), dtype=jnp.float32)
    w = jax.random.uniform(kw, (C_out, C_in), minval=-bound, maxval=bound,
                           dtype=jnp.float32)          # PyTorch layout (C_out, C_in)
    b = jax.random.uniform(kb, (C_out,), minval=-bound, maxval=bound,
                           dtype=jnp.float32)

    out = linear_block(x, jnp.transpose(w), b)          # default f32 operand path
    out = jax.block_until_ready(out)

    # Pure-JAX reference check of the forward semantics.
    ref = jnp.maximum(x, 0.0) @ w.T + b
    assert out.shape == (N, C_out)
    assert jnp.allclose(out, ref, atol=1e-5, rtol=1e-5)

    print("KERNEL_OK")
</pallas_src>

<mosaic_0001>
module attributes {stable_mosaic.version = 11 : i64} {
  func.func @_linear_block_kernel(%arg0: i32, %arg1: i32, %arg2: i32, %arg3: memref<8x128xf32, #tpu.memory_space<vmem>>, %arg4: memref<128x128xf32, #tpu.memory_space<vmem>>, %arg5: memref<1x128xf32, #tpu.memory_space<vmem>>, %arg6: memref<8x128xf32, #tpu.memory_space<vmem>>, %arg7: memref<8x128xf32, #tpu.memory_space<vmem>>) attributes {dimension_semantics = [#tpu.dimension_semantics<parallel>, #tpu.dimension_semantics<parallel>, #tpu.dimension_semantics<arbitrary>], iteration_bounds = array<i64: 1, 1, 1>, scalar_prefetch = 0 : i64, scratch_operands = 1 : i64, tpu.core_type = #tpu.core_type<tc>, window_params = [{transform_indices = @transform_0, window_bounds = array<i64: 8, 128>}, {transform_indices = @transform_1, window_bounds = array<i64: 128, 128>}, {transform_indices = @transform_2, window_bounds = array<i64: 1, 128>}, {transform_indices = @transform_3, window_bounds = array<i64: 8, 128>}]} {
    %c0_i32 = arith.constant 0 : i32
    %0 = arith.cmpi eq, %arg2, %c0_i32 : i32
    %1 = arith.extui %0 : i1 to i32
    %c0_i32_0 = arith.constant 0 : i32
    %2 = arith.cmpi ne, %1, %c0_i32_0 : i32
    scf.if %2 {
      %cst_11 = arith.constant 0.000000e+00 : f32
      %14 = vector.broadcast %cst_11 : f32 to vector<8x128xf32>
      %c0_12 = arith.constant 0 : index
      %c0_13 = arith.constant 0 : index
      %15 = vector.load %arg7[%c0_12, %c0_13] : memref<8x128xf32, #tpu.memory_space<vmem>>, vector<8x128xf32>
      tpu.vector_store %arg7[%c0_12, %c0_13], %14 {strides = array<i32>} : memref<8x128xf32, #tpu.memory_space<vmem>>, vector<8x128xf32>,
    } else {
    }
    %c0 = arith.constant 0 : index
    %c0_1 = arith.constant 0 : index
    %3 = vector.load %arg3[%c0, %c0_1] : memref<8x128xf32, #tpu.memory_space<vmem>>, vector<8x128xf32>
    %cst = arith.constant 0.000000e+00 : f32
    %4 = vector.broadcast %cst : f32 to vector<8x128xf32>
    %5 = arith.maximumf %3, %4 : vector<8x128xf32>
    %c0_2 = arith.constant 0 : index
    %c0_3 = arith.constant 0 : index
    %6 = vector.load %arg7[%c0_2, %c0_3] : memref<8x128xf32, #tpu.memory_space<vmem>>, vector<8x128xf32>
    %c0_4 = arith.constant 0 : index
    %c0_5 = arith.constant 0 : index
    %7 = vector.load %arg4[%c0_4, %c0_5] : memref<128x128xf32, #tpu.memory_space<vmem>>, vector<128x128xf32>
    %cst_6 = arith.constant dense<0.000000e+00> : vector<8x128xf32>
    %8 = tpu.matmul %5, %7, %cst_6 {dimension_numbers = #tpu.dot_dimension_numbers<[1], [0], [0], [1], [0, 0, 1, 1], [], []>} : vector<8x128xf32>, vector<128x128xf32>, vector<8x128xf32> -> vector<8x128xf32>
    %9 = arith.addf %6, %8 : vector<8x128xf32>
    %c0_7 = arith.constant 0 : index
    %c0_8 = arith.constant 0 : index
    %10 = vector.load %arg7[%c0_7, %c0_8] : memref<8x128xf32, #tpu.memory_space<vmem>>, vector<8x128xf32>
    tpu.vector_store %arg7[%c0_7, %c0_8], %9 {strides = array<i32>} : memref<8x128xf32, #tpu.memory_space<vmem>>, vector<8x128xf32>,
    %c0_i32_9 = arith.constant 0 : i32
    %11 = arith.cmpi eq, %arg2, %c0_i32_9 : i32
    %12 = arith.extui %11 : i1 to i32
    %c0_i32_10 = arith.constant 0 : i32
    %13 = arith.cmpi ne, %12, %c0_i32_10 : i32
    scf.if %13 {
      %c0_11 = arith.constant 0 : index
      %c0_12 = arith.constant 0 : index
      %14 = vector.load %arg7[%c0_11, %c0_12] : memref<8x128xf32, #tpu.memory_space<vmem>>, vector<8x128xf32>
      %c0_13 = arith.constant 0 : index
      %c0_14 = arith.constant 0 : index
      %15 = vector.load %arg5[%c0_13, %c0_14] : memref<1x128xf32, #tpu.memory_space<vmem>>, vector<1x128xf32>
      %16 = vector.broadcast %15 : vector<1x128xf32> to vector<8x128xf32>
      %17 = arith.addf %14, %16 : vector<8x128xf32>
      %c0_15 = arith.constant 0 : index
      %c0_16 = arith.constant 0 : index
      %18 = vector.load %arg6[%c0_15, %c0_16] : memref<8x128xf32, #tpu.memory_space<vmem>>, vector<8x128xf32>
      tpu.vector_store %arg6[%c0_15, %c0_16], %17 {strides = array<i32>} : memref<8x128xf32, #tpu.memory_space<vmem>>, vector<8x128xf32>,
    } else {
    }
    return
  }
  func.func @transform_0(%arg0: i32, %arg1: i32, %arg2: i32) -> (i32, i32) {
    %c0_i32 = arith.constant 0 : i32
    return %arg0, %arg2 : i32, i32
  }
  func.func @transform_1(%arg0: i32, %arg1: i32, %arg2: i32) -> (i32, i32) {
    %c0_i32 = arith.constant 0 : i32
    return %arg2, %arg1 : i32, i32
  }
  func.func @transform_2(%arg0: i32, %arg1: i32, %arg2: i32) -> (i32, i32) {
    %c0_i32 = arith.constant 0 : i32
    %c0_i32_0 = arith.constant 0 : i32
    return %c0_i32, %arg1 : i32, i32
  }
  func.func @transform_3(%arg0: i32, %arg1: i32, %arg2: i32) -> (i32, i32) {
    %c0_i32 = arith.constant 0 : i32
    return %arg0, %arg1 : i32, i32
  }
}

</mosaic_0001>

<bundles_post_ra>
// kernel: tpu_custom_call.1
= control target key start
LH: loop header
LB: loop body
LE: loop exit
PB: predicated region body
PF: predicated region fallthrough
CT: control target
= control target key end

     0   :  { %8 = vsyncpa [#allocation4], 0  ;;  %s397_s0 = inlined_call_operand.hbm [shape: f32[8,128], index: 0, kind: input, shape index: {}]   ;;  %s398_s1 = inlined_call_operand.hbm [shape: f32[128,128], index: 1, kind: input, shape index: {}]   ;;  %s399_s2 = inlined_call_operand.vmem [shape: f32[1,128], index: 2, kind: input, shape index: {}]   ;;  %s400_s3 = inlined_call_operand.hbm [shape: f32[8,128], index: 3, kind: output, shape index: {}]  }
   0x1   :  { %9 = vsyncpa [#allocation7], 0 }
   0x2   :  { %10 = vsyncpa [#allocation5], 0  ;;  %s323_s12 = smov [#allocation3]   ;;  %s324_s14 = smov [#allocation6]  }
   0x3   :  { %s17_s13 = sshll.u32 %s323_s12, 4  ;;  %s26_s15 = sshll.u32 %s324_s14, 4  ;;  %s18_s13 = int_to_ptr.vmem [resolvable:$true] %s17_s13  ;;  %s351_s15 = int_to_ptr.vmem [resolvable:$true] %s26_s15 }
   0x4   :  { %s251_s18 = scalar_lea.hbm %s397_s0, 128 }
   0x5   :  { %p252_p0 = scmp.ne.s32.totalorder %s397_s0, %s251_s18  ;;  %p255_p1 = scmp.lt.u32.totalorder %s251_s18, %s397_s0 }
   0x7   :  { %p257_p2 = pnand %p255_p1, %p252_p0 }
   0x9   :  { %260 = shalt.err (!%p257_p2)
}
   0xa   :  { %s261_s23 = scalar_lea.vmem %s18_s13, 128  ;;  %p266_p4 = scmp.lt.s32.totalorder %s18_s13, %s18_s13 }
   0xb   :  { %p262_p3 = scmp.ne.s32.totalorder %s18_s13, %s261_s23  ;;  %p267_p5 = scmp.lt.s32.totalorder %s261_s23, %s261_s23 }
   0xd   :  { %p268_p6 = por %p267_p5, %p266_p4 }
   0xf   :  { %p269_p7 = pnand %p268_p6, %p262_p3 }
  0x11   :  { %272 = shalt.err (!%p269_p7)
}
  0x12   :  { %20 = dma.hbm_to_vmem [thread:$0]  %s397_s0, 128, %s18_s13, [#allocation4]  }
  0x13   :  { %s273_s28 = scalar_lea.hbm %s398_s1, 2048 }
  0x14   :  { %p274_p8 = scmp.ne.s32.totalorder %s398_s1, %s273_s28  ;;  %p277_p9 = scmp.lt.u32.totalorder %s273_s28, %s398_s1 }
  0x16   :  { %p279_p10 = pnand %p277_p9, %p274_p8 }
  0x18   :  { %282 = shalt.err (!%p279_p10)
}
  0x19   :  { %s283_s6 = scalar_lea.vmem %s351_s15, 2048  ;;  %p288_p12 = scmp.lt.s32.totalorder %s351_s15, %s351_s15 }
  0x1a   :  { %p284_p11 = scmp.ne.s32.totalorder %s351_s15, %s283_s6  ;;  %p289_p13 = scmp.lt.s32.totalorder %s283_s6, %s283_s6 }
  0x1c   :  { %p290_p0 = por %p289_p13, %p288_p12 }
  0x1e   :  { %p291_p1 = pnand %p290_p0, %p284_p11 }
  0x20   :  { %294 = shalt.err (!%p291_p1)
}
  0x21   :  { %s325_s0 = smov 128   ;;  %s326_s7 = smov 8  }
  0x22   :  { %32 = dma.hbm_to_vmem [thread:$0]  %s398_s1, 2048, %s351_s15, [#allocation7], %s325_s0, %s325_s0, %s326_s7  }
  0x23   :  { %317 = dma.done.wait [#allocation4], 128  }
  0x24   :  { %318 = vsyncadd [#allocation4], 4294967168 }
  0x25   :  { %319 = dma.done.wait [#allocation7], 2048  }
  0x26   :  { %320 = vsyncadd [#allocation7], 4294965248  ;;  %v327_v0 = vmov 0.0|0.0   ;;  %vm328_vm0 = vmmov 0   ;;  %v329_v1 = vmov 0.0   ;;  %v49_v2 = vld [vmem:[#allocation6] sm:$0xff] }
  0x27   :  { %219 = vmatprep.subr.bf16.mxu0 %v327_v0  ;;  %216 = vmatprep.mubr.msk.f32.mxu0 %vm328_vm0, %v329_v1  ;;  %v50_v3 = vld [vmem:[#allocation6 + $0x8] sm:$0xff]  ;;  %v51_v4 = vld [vmem:[#allocation6 + $0x10] sm:$0xff]  ;;  %v52_v6 = vld [vmem:[#allocation6 + $0x18] sm:$0xff]  ;;  %s330_s11 = smov [#allocation8]  }
  0x28   :  { %v220_v5 = vpack.c.bf16 %v50_v3, %v49_v2  ;;  %v223_v7 = vpack.c.bf16 %v52_v6, %v51_v4  ;;  %v53_v8 = vld [vmem:[#allocation6 + $0x20] sm:$0xff]  ;;  %v54_v9 = vld [vmem:[#allocation6 + $0x28] sm:$0xff]  ;;  %v55_v11 = vld [vmem:[#allocation6 + $0x30] sm:$0xff]  ;;  %s156_s12 = sshll.u32 %s330_s11, 4  ;;  %s157_s12 = int_to_ptr.vmem [resolvable:$true] %s156_s12 }
  0x29   :  { %v226_v10 = vpack.c.bf16 %v54_v9, %v53_v8  ;;  %v56_v12 = vld [vmem:[#allocation6 + $0x38] sm:$0xff]  ;;  %v57_v14 = vld [vmem:[#allocation6 + $0x40] sm:$0xff]  ;;  %v58_v15 = vld [vmem:[#allocation6 + $0x48] sm:$0xff]  ;;  %s295_s13 = scalar_lea.vmem %s157_s12, 128  ;;  %p300_p3 = scmp.lt.s32.totalorder %s157_s12, %s157_s12 }
  0x2a   :  { %221 = vmatpush3.bf16.msra.mxu0 %v220_v5  ;;  %v229_v13 = vpack.c.bf16 %v56_v12, %v55_v11  ;;  %v232_v16 = vpack.c.bf16 %v58_v15, %v57_v14  ;;  %v59_v17 = vld [vmem:[#allocation6 + $0x50] sm:$0xff]  ;;  %v60_v18 = vld [vmem:[#allocation6 + $0x58] sm:$0xff]  ;;  %v61_v20 = vld [vmem:[#allocation6 + $0x60] sm:$0xff]  ;;  %p296_p2 = scmp.ne.s32.totalorder %s157_s12, %s295_s13  ;;  %p301_p4 = scmp.lt.s32.totalorder %s295_s13, %s295_s13 }
  0x2b   :  { %222 = vmatprep.subr.bf16.mxu0 %v327_v0  ;;  %v235_v19 = vpack.c.bf16 %v60_v18, %v59_v17  ;;  %v62_v21 = vld [vmem:[#allocation6 + $0x68] sm:$0xff]  ;;  %v63_v23 = vld [vmem:[#allocation6 + $0x70] sm:$0xff]  ;;  %v64_v24 = vld [vmem:[#allocation6 + $0x78] sm:$0xff] }
  0x2c   :  { %v238_v22 = vpack.c.bf16 %v62_v21, %v61_v20  ;;  %v241_v25 = vpack.c.bf16 %v64_v24, %v63_v23  ;;  %v46_v26 = vld [vmem:[#allocation3] sm:$0xff]  ;;  %p302_p5 = por %p301_p4, %p300_p3 }
  0x2d   :  { %v47_v27 = vmax.f32 %v46_v26, 0.0  ;;  %v166_v28 = vld [vmem:[%s399_s2] ss:$0 sm:$0xff] }
  0x2e   :  { %224 = vmatpush3.bf16.msra.mxu0 %v223_v7  ;;  %p303_p6 = pnand %p302_p5, %p296_p2 }
  0x2f   :  { %225 = vmatprep.subr.bf16.mxu0 %v327_v0 }
  0x32   :  { %227 = vmatpush3.bf16.msra.mxu0 %v226_v10 }
  0x33   :  { %228 = vmatprep.subr.bf16.mxu0 %v327_v0 }
  0x36   :  { %230 = vmatpush3.bf16.msra.mxu0 %v229_v13 }
  0x37   :  { %231 = vmatprep.subr.bf16.mxu0 %v327_v0 }
  0x3a   :  { %233 = vmatpush3.bf16.msra.mxu0 %v232_v16 }
  0x3b   :  { %234 = vmatprep.subr.bf16.mxu0 %v327_v0 }
  0x3e   :  { %236 = vmatpush3.bf16.msra.mxu0 %v235_v19 }
  0x3f   :  { %237 = vmatprep.subr.bf16.mxu0 %v327_v0 }
  0x42   :  { %239 = vmatpush3.bf16.msra.mxu0 %v238_v22 }
  0x43   :  { %240 = vmatprep.subr.bf16.mxu0 %v327_v0 }
  0x46   :  { %242 = vmatpush3.bf16.msra.mxu0 %v241_v25 }
  0x49   :  { %217 = vmatmul.mubr.f32.vlgmr.msra.gmra.mrb[0].mxu0 %v47_v27 }
 0x11c   :  { %v131_v29 = vpop.f32.mrb[0].mxu0 }
 0x11d   :  { %v148_v30 = vadd.f32 %v166_v28, %v131_v29  ;;  %v218_v31 = vpop.f32.mrb[1].mxu0 }
 0x11f   :  { %149 = vst [vmem:[#allocation8] sm:$0xff] %v148_v30 }
 0x120   :  { %306 = shalt.err (!%p303_p6)
}
 0x121   :  { %s307_s16 = scalar_lea.hbm %s400_s3, 128 }
 0x122   :  { %p308_p7 = scmp.ne.s32.totalorder %s400_s3, %s307_s16  ;;  %p311_p8 = scmp.lt.u32.totalorder %s307_s16, %s400_s3 }
 0x124   :  { %p313_p9 = pnand %p311_p8, %p308_p7 }
 0x126   :  { %316 = shalt.err (!%p313_p9)
}
 0x127   :  { %159 = dma.vmem_to_hbm [thread:$0]  %s157_s12, 128, %s400_s3, [#allocation5]  }
 0x128   :  { %321 = dma.done.wait [#allocation5], 128  }
 0x129   :  { %322 = vsyncadd [#allocation5], 4294967168 }
 0x12a   :  { %163 = vsyncpa [#allocation4], 1 }
 0x12b   :  { %164 = vsyncpa [#allocation7], 1 }
 0x12c   :  { %165 = vsyncpa [#allocation5], 1 }

</bundles_post_ra>
